<compile_context>
chip_gen: v5e
topology: v5e:2x2
jax: 0.10.0
libtpu: 0.0.40
codegen_flags: <defaults>
</compile_context>

<pallas_src>
from functools import partial

import jax
import jax.numpy as jnp
import numpy as np
from jax.experimental import pallas as pl
from jax.experimental.pallas import tpu as pltpu


def _build_patch(srcs, masks_ref, W, HW):
    """im2col patch for a 3x3 'same' conv over len(srcs) images.

    srcs: list of (C, HW) values (same compute dtype), one per image,
          channel-major, row-major flattened (H, W).
    masks_ref: (9, C, len(srcs)*HW) ref of exact 0/1 border masks (same dtype).
    Returns (9*C, len(srcs)*HW): row block t = kh*3+kw holds, for each image,
    the input shifted so column p carries x[p + (kh-1)*W + (kw-1)], with
    out-of-image taps zeroed (== zero padding).  Shift = one XLU lane roll.
    """
    rows = []
    for kh in range(3):
        for kw in range(3):
            s = (kh - 1) * W + (kw - 1)
            t = kh * 3 + kw
            if s == 0:                                     # center tap: no shift, no pad
                row = srcs[0] if len(srcs) == 1 else jnp.concatenate(srcs, axis=1)
            else:
                shifted = [pltpu.roll(x, (-s) % HW, 1) for x in srcs]
                row = shifted[0] if len(shifted) == 1 else jnp.concatenate(shifted, axis=1)
                row = row * masks_ref[t]                   # zero out out-of-image taps
            rows.append(row)
    return jnp.concatenate(rows, axis=0)                   # (9*C, B*HW)


def basic_block_kernel(x_ref, masks_ref, w1_ref, b1_ref, w2_ref, b2_ref,
                       out_ref, *, W, HW, B_TILE, compute_dtype):
    # conv1 (+ folded bn1 scale) -> bias -> relu : one bf16 MXU matmul, K = 9*C
    srcs1 = [x_ref[b].astype(compute_dtype) for b in range(B_TILE)]
    p1 = _build_patch(srcs1, masks_ref, W, HW).astype(jnp.bfloat16)
    y1 = jnp.dot(w1_ref[...], p1, preferred_element_type=jnp.float32)   # (C, B*HW)
    y1 = jnp.maximum(y1 + b1_ref[...], 0.0)

    # conv2 (+ folded bn2 scale) -> bias
    y1c = y1.astype(compute_dtype)
    srcs2 = [y1c[:, b * HW:(b + 1) * HW] for b in range(B_TILE)]
    p2 = _build_patch(srcs2, masks_ref, W, HW).astype(jnp.bfloat16)
    y2 = jnp.dot(w2_ref[...], p2, preferred_element_type=jnp.float32)   # (C, B*HW)
    y2 = y2 + b2_ref[...]

    # residual add + relu in f32, lane-dense stores (last dim = H*W)
    for b in range(B_TILE):
        out_ref[b] = jnp.maximum(y2[:, b * HW:(b + 1) * HW] + x_ref[b],
                                 0.0).astype(out_ref.dtype)


def _pick_compute_dtype():
    """bf16 elementwise on v6e/v7x (native bf16 VPU); f32 elsewhere (e.g. v5e)."""
    try:
        kind = jax.devices()[0].device_kind.lower()
    except Exception:
        return jnp.float32
    if "v6" in kind or "v7" in kind or "7x" in kind:
        return jnp.bfloat16
    return jnp.float32


def _pick_b_tile(N, C, HW, vmem_budget_bytes=24 << 20):
    """Largest divisor of N that keeps >= 2 grid steps (so both v7x TCs get work
    via the 'parallel' axis) and a comfortable VMEM footprint."""
    best = 1
    for b in range(1, N + 1):
        if N % b:
            continue
        if N >= 2 and N // b < 2:
            continue
        est = (2 * 2 * b * C * HW * 4        # double-buffered f32 in/out blocks
               + 2 * 9 * C * b * HW * 2      # live bf16 im2col patch (x2 slack)
               + 9 * C * b * HW * 4          # pre-broadcast masks (f32 worst case)
               + 6 * C * b * HW * 4)         # f32 intermediates (y1, y2, ...)
        if est <= vmem_budget_bytes:
            best = b
    return best


def basic_block_forward(x_nchw, params, *, compute_dtype=jnp.float32, b_tile=None):
    """BasicBlock forward: stride=1, downsample=None (so inplanes == planes)."""
    # TODO(synk): stride > 1 and the optional downsample branch are not implemented
    #             (module defaults: stride=1, downsample=None).
    # TODO(synk): training-mode BatchNorm (batch statistics / running-stat updates)
    #             is not reproduced; eval-mode BN is folded into the conv weights.
    w1, s1, b1, w2, s2, b2 = params
    N, Cin, H, W = x_nchw.shape
    C = w1.shape[0]
    assert Cin == C, "no downsample: inplanes must equal planes"
    HW = H * W
    assert HW % 128 == 0 and C % 8 == 0, "lane/sublane-dense layout assumption"

    if b_tile is None:
        b_tile = _pick_b_tile(N, C, HW)
    assert N % b_tile == 0
    grid_n = N // b_tile

    # Free reshape to channel-major flattened layout (no transpose, no pad).
    x_cm = x_nchw.reshape(N, C, HW).astype(jnp.float32)

    def fold(w, s):
        # (O, I, 3, 3) -> (O, kh, kw, I) -> (O, 9*I), BN scale folded over O.
        wm = jnp.transpose(w, (0, 2, 3, 1)).reshape(C, 9 * C)
        return (wm * s[:, None]).astype(jnp.bfloat16)

    w1m, w2m = fold(w1, s1), fold(w2, s2)
    b1c = b1.reshape(C, 1).astype(jnp.float32)
    b2c = b2.reshape(C, 1).astype(jnp.float32)

    # 0/1 border masks (zero padding) per tap, pre-broadcast to (9, C, b_tile*HW)
    # so the kernel never does a sublane broadcast.
    hh, ww = np.meshgrid(np.arange(H), np.arange(W), indexing="ij")
    m = np.zeros((9, HW), np.float32)
    for kh in range(3):
        for kw in range(3):
            dh, dw = kh - 1, kw - 1
            valid = ((hh + dh >= 0) & (hh + dh < H) &
                     (ww + dw >= 0) & (ww + dw < W))
            m[kh * 3 + kw] = valid.reshape(-1).astype(np.float32)
    masks_np = np.tile(m[:, None, :], (1, C, b_tile))          # (9, C, b_tile*HW)
    masks = jnp.asarray(masks_np, dtype=compute_dtype)         # exact 0/1 in bf16 too

    out_cm = pl.pallas_call(
        partial(basic_block_kernel, W=W, HW=HW, B_TILE=b_tile,
                compute_dtype=compute_dtype),
        out_shape=jax.ShapeDtypeStruct((N, C, HW), jnp.float32),
        grid=(grid_n,),
        in_specs=[
            pl.BlockSpec((b_tile, C, HW), lambda n: (n, 0, 0)),      # x (also residual)
            pl.BlockSpec((9, C, b_tile * HW), lambda n: (0, 0, 0)),  # padding masks
            pl.BlockSpec((C, 9 * C), lambda n: (0, 0)),              # conv1*bn1 weights
            pl.BlockSpec((C, 1), lambda n: (0, 0)),                  # bn1 bias
            pl.BlockSpec((C, 9 * C), lambda n: (0, 0)),              # conv2*bn2 weights
            pl.BlockSpec((C, 1), lambda n: (0, 0)),                  # bn2 bias
        ],
        out_specs=pl.BlockSpec((b_tile, C, HW), lambda n: (n, 0, 0)),
        compiler_params=pltpu.CompilerParams(
            dimension_semantics=("parallel",)),                      # v7x: split over TCs
    )(x_cm, masks, w1m, b1c, w2m, b2c)

    return out_cm.reshape(N, C, H, W)                                # free reshape


def reference_forward(x_nchw, params):
    """Pure-JAX reference (eval-mode BN fold, same bf16 matmul quantization)."""
    w1, s1, b1, w2, s2, b2 = params
    x = jnp.transpose(x_nchw, (0, 2, 3, 1)).astype(jnp.float32)       # NHWC
    w1k = jnp.transpose(w1 * s1[:, None, None, None],
                        (2, 3, 1, 0)).astype(jnp.bfloat16)            # HWIO
    w2k = jnp.transpose(w2 * s2[:, None, None, None],
                        (2, 3, 1, 0)).astype(jnp.bfloat16)
    dn = ("NHWC", "HWIO", "NHWC")
    y = jax.lax.conv_general_dilated(x.astype(jnp.bfloat16), w1k, (1, 1), "SAME",
                                     dimension_numbers=dn,
                                     preferred_element_type=jnp.float32)
    y = jnp.maximum(y + b1, 0.0)
    y = jax.lax.conv_general_dilated(y.astype(jnp.bfloat16), w2k, (1, 1), "SAME",
                                     dimension_numbers=dn,
                                     preferred_element_type=jnp.float32)
    y = y + b2
    y = jnp.maximum(y + x, 0.0)
    return jnp.transpose(y, (0, 3, 1, 2))                             # NCHW


if __name__ == "__main__":
    key = jax.random.PRNGKey(0)
    C, H, W = 8, 16, 16   # inplanes == planes == 8, stride=1, downsample=None
    ks = jax.random.split(key, 12)

    w1 = 0.1 * jax.random.normal(ks[0], (C, C, 3, 3), jnp.float32)
    w2 = 0.1 * jax.random.normal(ks[1], (C, C, 3, 3), jnp.float32)

    eps = 1e-5

    def fold_bn(gk, bk, mk, vk):
        gamma = 1.0 + 0.1 * jax.random.normal(gk, (C,), jnp.float32)
        beta = 0.1 * jax.random.normal(bk, (C,), jnp.float32)
        rmean = 0.1 * jax.random.normal(mk, (C,), jnp.float32)
        rvar = 1.0 + 0.1 * jax.random.uniform(vk, (C,), jnp.float32)
        scale = gamma / jnp.sqrt(rvar + eps)
        bias = beta - rmean * scale
        return scale, bias

    s1, b1 = fold_bn(ks[2], ks[3], ks[4], ks[5])
    s2, b2 = fold_bn(ks[6], ks[7], ks[8], ks[9])
    params = (w1, s1, b1, w2, s2, b2)

    x_small = jax.random.normal(ks[10], (2, C, H, W), jnp.float32)   # B_TILE=1, grid=2
    x_batch = jax.random.normal(ks[11], (4, C, H, W), jnp.float32)   # B_TILE=2, grid=2

    compute_dtype = _pick_compute_dtype()
    try:
        out_small = jax.block_until_ready(
            basic_block_forward(x_small, params, compute_dtype=compute_dtype))
    except Exception:
        if compute_dtype == jnp.float32:
            raise
        # Safety net: fall back to the f32 elementwise (v5e-style) path.
        compute_dtype = jnp.float32
        out_small = jax.block_until_ready(
            basic_block_forward(x_small, params, compute_dtype=compute_dtype))

    out_batch = jax.block_until_ready(
        basic_block_forward(x_batch, params, compute_dtype=compute_dtype))

    ref_small = reference_forward(x_small, params)
    ref_batch = reference_forward(x_batch, params)

    # bf16 MXU inputs (matched in the reference) -> tolerance above f32 level.
    np.testing.assert_allclose(np.asarray(out_small), np.asarray(ref_small),
                               rtol=1e-2, atol=1e-2)
    np.testing.assert_allclose(np.asarray(out_batch), np.asarray(ref_batch),
                               rtol=1e-2, atol=1e-2)
    print("KERNEL_OK")
</pallas_src>

<mosaic_0001>
module attributes {stable_mosaic.version = 11 : i64} {
  func.func @basic_block_kernel(%arg0: i32, %arg1: memref<1x8x256xf32, #tpu.memory_space<vmem>>, %arg2: memref<9x8x256xf32, #tpu.memory_space<vmem>>, %arg3: memref<8x72xbf16, #tpu.memory_space<vmem>>, %arg4: memref<8x1xf32, #tpu.memory_space<vmem>>, %arg5: memref<8x72xbf16, #tpu.memory_space<vmem>>, %arg6: memref<8x1xf32, #tpu.memory_space<vmem>>, %arg7: memref<1x8x256xf32, #tpu.memory_space<vmem>>) attributes {dimension_semantics = [#tpu.dimension_semantics<parallel>], iteration_bounds = array<i64: 2>, scalar_prefetch = 0 : i64, scratch_operands = 0 : i64, tpu.core_type = #tpu.core_type<tc>, window_params = [{transform_indices = @transform_0, window_bounds = array<i64: 1, 8, 256>}, {pipeline_mode = #tpu.pipeline_mode<synchronous>, transform_indices = @transform_1, window_bounds = array<i64: 9, 8, 256>}, {pipeline_mode = #tpu.pipeline_mode<synchronous>, transform_indices = @transform_2, window_bounds = array<i64: 8, 72>}, {pipeline_mode = #tpu.pipeline_mode<synchronous>, transform_indices = @transform_3, window_bounds = array<i64: 8, 1>}, {pipeline_mode = #tpu.pipeline_mode<synchronous>, transform_indices = @transform_4, window_bounds = array<i64: 8, 72>}, {pipeline_mode = #tpu.pipeline_mode<synchronous>, transform_indices = @transform_5, window_bounds = array<i64: 8, 1>}, {transform_indices = @transform_6, window_bounds = array<i64: 1, 8, 256>}]} {
    %c0 = arith.constant 0 : index
    %c0_0 = arith.constant 0 : index
    %c0_1 = arith.constant 0 : index
    %0 = vector.load %arg1[%c0, %c0_0, %c0_1] : memref<1x8x256xf32, #tpu.memory_space<vmem>>, vector<1x8x256xf32>
    %1 = vector.shape_cast %0 : vector<1x8x256xf32> to vector<8x256xf32>
    %c17_i32 = arith.constant 17 : i32
    %2 = tpu.dynamic_rotate %1 by %c17_i32 dim 1 : vector<8x256xf32>, i32 -> vector<8x256xf32>
    %c0_2 = arith.constant 0 : index
    %c0_3 = arith.constant 0 : index
    %c0_4 = arith.constant 0 : index
    %3 = vector.load %arg2[%c0_2, %c0_3, %c0_4] : memref<9x8x256xf32, #tpu.memory_space<vmem>>, vector<1x8x256xf32>
    %4 = vector.shape_cast %3 : vector<1x8x256xf32> to vector<8x256xf32>
    %5 = arith.mulf %2, %4 : vector<8x256xf32>
    %c16_i32 = arith.constant 16 : i32
    %6 = tpu.dynamic_rotate %1 by %c16_i32 dim 1 : vector<8x256xf32>, i32 -> vector<8x256xf32>
    %c1 = arith.constant 1 : index
    %c0_5 = arith.constant 0 : index
    %c0_6 = arith.constant 0 : index
    %7 = vector.load %arg2[%c1, %c0_5, %c0_6] : memref<9x8x256xf32, #tpu.memory_space<vmem>>, vector<1x8x256xf32>
    %8 = vector.shape_cast %7 : vector<1x8x256xf32> to vector<8x256xf32>
    %9 = arith.mulf %6, %8 : vector<8x256xf32>
    %c15_i32 = arith.constant 15 : i32
    %10 = tpu.dynamic_rotate %1 by %c15_i32 dim 1 : vector<8x256xf32>, i32 -> vector<8x256xf32>
    %c2 = arith.constant 2 : index
    %c0_7 = arith.constant 0 : index
    %c0_8 = arith.constant 0 : index
    %11 = vector.load %arg2[%c2, %c0_7, %c0_8] : memref<9x8x256xf32, #tpu.memory_space<vmem>>, vector<1x8x256xf32>
    %12 = vector.shape_cast %11 : vector<1x8x256xf32> to vector<8x256xf32>
    %13 = arith.mulf %10, %12 : vector<8x256xf32>
    %c1_i32 = arith.constant 1 : i32
    %14 = tpu.dynamic_rotate %1 by %c1_i32 dim 1 : vector<8x256xf32>, i32 -> vector<8x256xf32>
    %c3 = arith.constant 3 : index
    %c0_9 = arith.constant 0 : index
    %c0_10 = arith.constant 0 : index
    %15 = vector.load %arg2[%c3, %c0_9, %c0_10] : memref<9x8x256xf32, #tpu.memory_space<vmem>>, vector<1x8x256xf32>
    %16 = vector.shape_cast %15 : vector<1x8x256xf32> to vector<8x256xf32>
    %17 = arith.mulf %14, %16 : vector<8x256xf32>
    %c255_i32 = arith.constant 255 : i32
    %18 = tpu.dynamic_rotate %1 by %c255_i32 dim 1 : vector<8x256xf32>, i32 -> vector<8x256xf32>
    %c5 = arith.constant 5 : index
    %c0_11 = arith.constant 0 : index
    %c0_12 = arith.constant 0 : index
    %19 = vector.load %arg2[%c5, %c0_11, %c0_12] : memref<9x8x256xf32, #tpu.memory_space<vmem>>, vector<1x8x256xf32>
    %20 = vector.shape_cast %19 : vector<1x8x256xf32> to vector<8x256xf32>
    %21 = arith.mulf %18, %20 : vector<8x256xf32>
    %c241_i32 = arith.constant 241 : i32
    %22 = tpu.dynamic_rotate %1 by %c241_i32 dim 1 : vector<8x256xf32>, i32 -> vector<8x256xf32>
    %c6 = arith.constant 6 : index
    %c0_13 = arith.constant 0 : index
    %c0_14 = arith.constant 0 : index
    %23 = vector.load %arg2[%c6, %c0_13, %c0_14] : memref<9x8x256xf32, #tpu.memory_space<vmem>>, vector<1x8x256xf32>
    %24 = vector.shape_cast %23 : vector<1x8x256xf32> to vector<8x256xf32>
    %25 = arith.mulf %22, %24 : vector<8x256xf32>
    %c240_i32 = arith.constant 240 : i32
    %26 = tpu.dynamic_rotate %1 by %c240_i32 dim 1 : vector<8x256xf32>, i32 -> vector<8x256xf32>
    %c7 = arith.constant 7 : index
    %c0_15 = arith.constant 0 : index
    %c0_16 = arith.constant 0 : index
    %27 = vector.load %arg2[%c7, %c0_15, %c0_16] : memref<9x8x256xf32, #tpu.memory_space<vmem>>, vector<1x8x256xf32>
    %28 = vector.shape_cast %27 : vector<1x8x256xf32> to vector<8x256xf32>
    %29 = arith.mulf %26, %28 : vector<8x256xf32>
    %c239_i32 = arith.constant 239 : i32
    %30 = tpu.dynamic_rotate %1 by %c239_i32 dim 1 : vector<8x256xf32>, i32 -> vector<8x256xf32>
    %c8 = arith.constant 8 : index
    %c0_17 = arith.constant 0 : index
    %c0_18 = arith.constant 0 : index
    %31 = vector.load %arg2[%c8, %c0_17, %c0_18] : memref<9x8x256xf32, #tpu.memory_space<vmem>>, vector<1x8x256xf32>
    %32 = vector.shape_cast %31 : vector<1x8x256xf32> to vector<8x256xf32>
    %33 = arith.mulf %30, %32 : vector<8x256xf32>
    %34 = tpu.concatenate %5, %9, %13, %17, %1, %21, %25, %29, %33 in 0 : vector<8x256xf32>, vector<8x256xf32>, vector<8x256xf32>, vector<8x256xf32>, vector<8x256xf32>, vector<8x256xf32>, vector<8x256xf32>, vector<8x256xf32>, vector<8x256xf32> -> vector<72x256xf32>
    %35 = arith.truncf %34 : vector<72x256xf32> to vector<72x256xbf16>
    %c0_19 = arith.constant 0 : index
    %c0_20 = arith.constant 0 : index
    %36 = vector.load %arg3[%c0_19, %c0_20] : memref<8x72xbf16, #tpu.memory_space<vmem>>, vector<8x72xbf16>
    %cst = arith.constant dense<0.000000e+00> : vector<8x256xf32>
    %37 = tpu.matmul %36, %35, %cst {dimension_numbers = #tpu.dot_dimension_numbers<[1], [0], [0], [1], [0, 0, 1, 1], [], []>} : vector<8x72xbf16>, vector<72x256xbf16>, vector<8x256xf32> -> vector<8x256xf32>
    %c0_21 = arith.constant 0 : index
    %c0_22 = arith.constant 0 : index
    %38 = vector.load %arg4[%c0_21, %c0_22] : memref<8x1xf32, #tpu.memory_space<vmem>>, vector<8x1xf32>
    %39 = vector.broadcast %38 : vector<8x1xf32> to vector<8x256xf32>
    %40 = arith.addf %37, %39 : vector<8x256xf32>
    %cst_23 = arith.constant 0.000000e+00 : f32
    %41 = vector.broadcast %cst_23 : f32 to vector<8x256xf32>
    %42 = arith.maximumf %40, %41 : vector<8x256xf32>
    %c17_i32_24 = arith.constant 17 : i32
    %43 = tpu.dynamic_rotate %42 by %c17_i32_24 dim 1 : vector<8x256xf32>, i32 -> vector<8x256xf32>
    %c0_25 = arith.constant 0 : index
    %c0_26 = arith.constant 0 : index
    %c0_27 = arith.constant 0 : index
    %44 = vector.load %arg2[%c0_25, %c0_26, %c0_27] : memref<9x8x256xf32, #tpu.memory_space<vmem>>, vector<1x8x256xf32>
    %45 = vector.shape_cast %44 : vector<1x8x256xf32> to vector<8x256xf32>
    %46 = arith.mulf %43, %45 : vector<8x256xf32>
    %c16_i32_28 = arith.constant 16 : i32
    %47 = tpu.dynamic_rotate %42 by %c16_i32_28 dim 1 : vector<8x256xf32>, i32 -> vector<8x256xf32>
    %c1_29 = arith.constant 1 : index
    %c0_30 = arith.constant 0 : index
    %c0_31 = arith.constant 0 : index
    %48 = vector.load %arg2[%c1_29, %c0_30, %c0_31] : memref<9x8x256xf32, #tpu.memory_space<vmem>>, vector<1x8x256xf32>
    %49 = vector.shape_cast %48 : vector<1x8x256xf32> to vector<8x256xf32>
    %50 = arith.mulf %47, %49 : vector<8x256xf32>
    %c15_i32_32 = arith.constant 15 : i32
    %51 = tpu.dynamic_rotate %42 by %c15_i32_32 dim 1 : vector<8x256xf32>, i32 -> vector<8x256xf32>
    %c2_33 = arith.constant 2 : index
    %c0_34 = arith.constant 0 : index
    %c0_35 = arith.constant 0 : index
    %52 = vector.load %arg2[%c2_33, %c0_34, %c0_35] : memref<9x8x256xf32, #tpu.memory_space<vmem>>, vector<1x8x256xf32>
    %53 = vector.shape_cast %52 : vector<1x8x256xf32> to vector<8x256xf32>
    %54 = arith.mulf %51, %53 : vector<8x256xf32>
    %c1_i32_36 = arith.constant 1 : i32
    %55 = tpu.dynamic_rotate %42 by %c1_i32_36 dim 1 : vector<8x256xf32>, i32 -> vector<8x256xf32>
    %c3_37 = arith.constant 3 : index
    %c0_38 = arith.constant 0 : index
    %c0_39 = arith.constant 0 : index
    %56 = vector.load %arg2[%c3_37, %c0_38, %c0_39] : memref<9x8x256xf32, #tpu.memory_space<vmem>>, vector<1x8x256xf32>
    %57 = vector.shape_cast %56 : vector<1x8x256xf32> to vector<8x256xf32>
    %58 = arith.mulf %55, %57 : vector<8x256xf32>
    %c255_i32_40 = arith.constant 255 : i32
    %59 = tpu.dynamic_rotate %42 by %c255_i32_40 dim 1 : vector<8x256xf32>, i32 -> vector<8x256xf32>
    %c5_41 = arith.constant 5 : index
    %c0_42 = arith.constant 0 : index
    %c0_43 = arith.constant 0 : index
    %60 = vector.load %arg2[%c5_41, %c0_42, %c0_43] : memref<9x8x256xf32, #tpu.memory_space<vmem>>, vector<1x8x256xf32>
    %61 = vector.shape_cast %60 : vector<1x8x256xf32> to vector<8x256xf32>
    %62 = arith.mulf %59, %61 : vector<8x256xf32>
    %c241_i32_44 = arith.constant 241 : i32
    %63 = tpu.dynamic_rotate %42 by %c241_i32_44 dim 1 : vector<8x256xf32>, i32 -> vector<8x256xf32>
    %c6_45 = arith.constant 6 : index
    %c0_46 = arith.constant 0 : index
    %c0_47 = arith.constant 0 : index
    %64 = vector.load %arg2[%c6_45, %c0_46, %c0_47] : memref<9x8x256xf32, #tpu.memory_space<vmem>>, vector<1x8x256xf32>
    %65 = vector.shape_cast %64 : vector<1x8x256xf32> to vector<8x256xf32>
    %66 = arith.mulf %63, %65 : vector<8x256xf32>
    %c240_i32_48 = arith.constant 240 : i32
    %67 = tpu.dynamic_rotate %42 by %c240_i32_48 dim 1 : vector<8x256xf32>, i32 -> vector<8x256xf32>
    %c7_49 = arith.constant 7 : index
    %c0_50 = arith.constant 0 : index
    %c0_51 = arith.constant 0 : index
    %68 = vector.load %arg2[%c7_49, %c0_50, %c0_51] : memref<9x8x256xf32, #tpu.memory_space<vmem>>, vector<1x8x256xf32>
    %69 = vector.shape_cast %68 : vector<1x8x256xf32> to vector<8x256xf32>
    %70 = arith.mulf %67, %69 : vector<8x256xf32>
    %c239_i32_52 = arith.constant 239 : i32
    %71 = tpu.dynamic_rotate %42 by %c239_i32_52 dim 1 : vector<8x256xf32>, i32 -> vector<8x256xf32>
    %c8_53 = arith.constant 8 : index
    %c0_54 = arith.constant 0 : index
    %c0_55 = arith.constant 0 : index
    %72 = vector.load %arg2[%c8_53, %c0_54, %c0_55] : memref<9x8x256xf32, #tpu.memory_space<vmem>>, vector<1x8x256xf32>
    %73 = vector.shape_cast %72 : vector<1x8x256xf32> to vector<8x256xf32>
    %74 = arith.mulf %71, %73 : vector<8x256xf32>
    %75 = tpu.concatenate %46, %50, %54, %58, %42, %62, %66, %70, %74 in 0 : vector<8x256xf32>, vector<8x256xf32>, vector<8x256xf32>, vector<8x256xf32>, vector<8x256xf32>, vector<8x256xf32>, vector<8x256xf32>, vector<8x256xf32>, vector<8x256xf32> -> vector<72x256xf32>
    %76 = arith.truncf %75 : vector<72x256xf32> to vector<72x256xbf16>
    %c0_56 = arith.constant 0 : index
    %c0_57 = arith.constant 0 : index
    %77 = vector.load %arg5[%c0_56, %c0_57] : memref<8x72xbf16, #tpu.memory_space<vmem>>, vector<8x72xbf16>
    %cst_58 = arith.constant dense<0.000000e+00> : vector<8x256xf32>
    %78 = tpu.matmul %77, %76, %cst_58 {dimension_numbers = #tpu.dot_dimension_numbers<[1], [0], [0], [1], [0, 0, 1, 1], [], []>} : vector<8x72xbf16>, vector<72x256xbf16>, vector<8x256xf32> -> vector<8x256xf32>
    %c0_59 = arith.constant 0 : index
    %c0_60 = arith.constant 0 : index
    %79 = vector.load %arg6[%c0_59, %c0_60] : memref<8x1xf32, #tpu.memory_space<vmem>>, vector<8x1xf32>
    %80 = vector.broadcast %79 : vector<8x1xf32> to vector<8x256xf32>
    %81 = arith.addf %78, %80 : vector<8x256xf32>
    %c0_61 = arith.constant 0 : index
    %c0_62 = arith.constant 0 : index
    %c0_63 = arith.constant 0 : index
    %82 = vector.load %arg1[%c0_61, %c0_62, %c0_63] : memref<1x8x256xf32, #tpu.memory_space<vmem>>, vector<1x8x256xf32>
    %83 = vector.shape_cast %82 : vector<1x8x256xf32> to vector<8x256xf32>
    %84 = arith.addf %81, %83 : vector<8x256xf32>
    %cst_64 = arith.constant 0.000000e+00 : f32
    %85 = vector.broadcast %cst_64 : f32 to vector<8x256xf32>
    %86 = arith.maximumf %84, %85 : vector<8x256xf32>
    %c0_65 = arith.constant 0 : index
    %c0_66 = arith.constant 0 : index
    %c0_67 = arith.constant 0 : index
    %87 = vector.load %arg7[%c0_65, %c0_66, %c0_67] : memref<1x8x256xf32, #tpu.memory_space<vmem>>, vector<1x8x256xf32>
    %88 = vector.shape_cast %87 : vector<1x8x256xf32> to vector<8x256xf32>
    %89 = vector.shape_cast %86 : vector<8x256xf32> to vector<1x8x256xf32>
    tpu.vector_store %arg7[%c0_65, %c0_66, %c0_67], %89 {strides = array<i32>} : memref<1x8x256xf32, #tpu.memory_space<vmem>>, vector<1x8x256xf32>,
    return
  }
  func.func @transform_0(%arg0: i32) -> (i32, i32, i32) {
    %c0_i32 = arith.constant 0 : i32
    %c0_i32_0 = arith.constant 0 : i32
    %c0_i32_1 = arith.constant 0 : i32
    return %arg0, %c0_i32, %c0_i32_0 : i32, i32, i32
  }
  func.func @transform_1(%arg0: i32) -> (i32, i32, i32) {
    %c0_i32 = arith.constant 0 : i32
    %c0_i32_0 = arith.constant 0 : i32
    %c0_i32_1 = arith.constant 0 : i32
    %c0_i32_2 = arith.constant 0 : i32
    return %c0_i32, %c0_i32_0, %c0_i32_1 : i32, i32, i32
  }
  func.func @transform_2(%arg0: i32) -> (i32, i32) {
    %c0_i32 = arith.constant 0 : i32
    %c0_i32_0 = arith.constant 0 : i32
    %c0_i32_1 = arith.constant 0 : i32
    return %c0_i32, %c0_i32_0 : i32, i32
  }
  func.func @transform_3(%arg0: i32) -> (i32, i32) {
    %c0_i32 = arith.constant 0 : i32
    %c0_i32_0 = arith.constant 0 : i32
    %c0_i32_1 = arith.constant 0 : i32
    return %c0_i32, %c0_i32_0 : i32, i32
  }
  func.func @transform_4(%arg0: i32) -> (i32, i32) {
    %c0_i32 = arith.constant 0 : i32
    %c0_i32_0 = arith.constant 0 : i32
    %c0_i32_1 = arith.constant 0 : i32
    return %c0_i32, %c0_i32_0 : i32, i32
  }
  func.func @transform_5(%arg0: i32) -> (i32, i32) {
    %c0_i32 = arith.constant 0 : i32
    %c0_i32_0 = arith.constant 0 : i32
    %c0_i32_1 = arith.constant 0 : i32
    return %c0_i32, %c0_i32_0 : i32, i32
  }
  func.func @transform_6(%arg0: i32) -> (i32, i32, i32) {
    %c0_i32 = arith.constant 0 : i32
    %c0_i32_0 = arith.constant 0 : i32
    %c0_i32_1 = arith.constant 0 : i32
    return %arg0, %c0_i32, %c0_i32_0 : i32, i32, i32
  }
}

</mosaic_0001>

<bundles_post_ra>
// kernel: tpu_custom_call.1
= control target key start
LH: loop header
LB: loop body
LE: loop exit
PB: predicated region body
PF: predicated region fallthrough
CT: control target
= control target key end

     0   :  { %11 = vsyncpa [#allocation3], 0  ;;  %s1287_s0 = inlined_call_operand.hbm [shape: f32[2,8,256], index: 0, kind: input, shape index: {}]   ;;  %s1288_s1 = inlined_call_operand.hbm [shape: f32[9,8,256], index: 1, kind: input, shape index: {}]   ;;  %s1289_s2 = inlined_call_operand.vmem [shape: bf16[8,72], index: 2, kind: input, shape index: {}]   ;;  %s1290_s3 = inlined_call_operand.vmem [shape: f32[8,1], index: 3, kind: input, shape index: {}]   ;;  %s1291_s4 = inlined_call_operand.vmem [shape: bf16[8,72], index: 4, kind: input, shape index: {}]   ;;  %s1292_s5 = inlined_call_operand.vmem [shape: f32[8,1], index: 5, kind: input, shape index: {}]   ;;  %s1293_s6 = inlined_call_operand.hbm [shape: f32[2,8,256], index: 6, kind: output, shape index: {}]  }
   0x1   :  { %13 = vsyncpa [#allocation3 + $0x1], 0 }
   0x2   :  { %14 = vsyncpa [#allocation6], 0 }
   0x3   :  { %15 = vsyncpa [#allocation4], 0 }
   0x4   :  { %17 = vsyncpa [#allocation4 + $0x1], 0  ;;  %s933_s21 = smov 0   ;;  %s935_s22 = smov 0  }
   0x5   :  { %s937_s23 = smov 0   ;;  %s939_s24 = smov 0  }
   0x6 LB: > { %s196_s27 = sshll.u32 %s1288_s1, 4  ;;  %s957_s28 = sadd.s32 4294967295, %s884_s24   ;;  %s884_s24 = sphi %s939_s24, %s1303_s24   ;;  %s880_s23 = sphi %s937_s23, %s1302_s23   ;;  %s876_s22 = sphi %s935_s22, %s1301_s22   ;;  %s872_s21 = sphi %s933_s21, %s1300_s21   ;;  %s197_s27 = int_to_ptr.hbm [resolvable:$true] %s196_s27 }
   0x7   : > { %p663_p0 = scmp.ge.s32.totalorder %s884_s24, 1  ;;  %p44_p1 = scmp.eq.s32.totalorder %s957_s28, 0 }
   0x8   : > { %p185_p2 = scmp.lt.s32.totalorder %s884_s24, 3  ;;  %s886_s30 = smov [#allocation5]  }
   0x9   : > { %s198_s7 = sshll.u32 %s886_s30, 4  ;;  %s887_s8 = smov 256   ;;  %s199_s7 = int_to_ptr.vmem [resolvable:$true] %s198_s7 }
   0xa   : > { %p962_p3 = pnand %p663_p0, %p185_p2  ;;  %s888_s9 = smov 16  }
   0xb   : > { %s662_s10 = sadd.s32 4294967294, %s884_s24   ;;  %s973_s11 = sadd.s32 1, %s884_s24  }
   0xc   : > { %p692_p4 = pneg %p962_p3  ;;  %s30_s12 = sadd.s32 1, %s880_s23 }
   0xd   : > { %s27_s13 = ssub.s32 %s884_s24, %s973_s11  ;;  %p37_p7 = scmp.ne.s32.totalorder %s880_s23, %s876_s22 }
   0xe   : > { %p693_p6 = pnand %p692_p4, %p44_p1  ;;  %p28_p8 = scmp.eq.s32.totalorder %s27_s13, 0 }
   0xf   : > { %p38_p9 = scmp.eq.s32.totalorder %s884_s24, 0  ;;  %p43_p10 = scmp.ne.s32.totalorder %s876_s22, %s872_s21 }
  0x10   : > { %695 = dma.hbm_to_vmem [thread:$0]  (!%p693_p6), %s197_s27, 2304, %s199_s7, [#allocation6], %s887_s8, %s887_s8, %s888_s9  }
  0x11   : > { %p172_p11 = scmp.eq.s32.totalorder %s957_s28, 1  ;;  %p989_p12 = por %p44_p1, %p43_p10 }
  0x12   : > { %s985_s14 = scalar_select %p28_p8, %s880_s23, %s30_s12  }
  0x13   : > { %p993_p13 = por %p172_p11, %p37_p7  ;;  %p178_p0 = scmp.eq.s32.totalorder %s662_s10, 1 }
  0x14   : > { %p39_p2 = por %p38_p9, %p37_p7  ;;  %s224_s17 = sand.u32 1, %s880_s23  }
  0x15   : > { %p998_p4 = por %p178_p0, %p43_p10  ;;  %p705_p6 = scmp.lt.s32.totalorder %s884_s24, 2 }
  0x16   : > { %s666_s19 = sshll.u32 %s224_s17, 4  ;;  %s682_s20 = sshll.u32 %s884_s24, 4 }
  0x17   : > { %s233_s27 = scalar_lea.hbm %s1287_s0, %s682_s20  ;;  %s228_s7 = scalar_lea.vmem [#allocation2], %s666_s19 }
  0x18   : > { %s235_s30 = sshll.u32 %s233_s27, 4  ;;  %s237_s8 = sshll.u32 %s228_s7, 4  ;;  %s236_s30 = int_to_ptr.hbm [resolvable:$true] %s235_s30  ;;  %s238_s8 = int_to_ptr.vmem [resolvable:$true] %s237_s8 }
  0x19   : > { %p1007_p8 = pnand %p705_p6, %p39_p2  ;;  %s225_s10 = scalar_lea.sflag [#allocation3], %s224_s17 }
  0x1a   : > { %s784_s12 = sshra.s32 %s236_s30, 4  ;;  %s791_s19 = scalar_lea.hbm %s1287_s0, 32  ;;  %s785_s12 = int_to_ptr.hbm [resolvable:$true] %s784_s12 }
  0x1b   : > { %s786_s13 = scalar_lea.hbm %s785_s12, 16  ;;  %p788_p9 = pneg %p1007_p8 }
  0x1c   : > { %p787_p7 = scmp.ne.s32.totalorder %s785_s12, %s786_s13  ;;  %p792_p0 = scmp.lt.s32.totalorder %s785_s12, %s1287_s0 }
  0x1d   : > { %p793_p2 = scmp.lt.s32.totalorder %s791_s19, %s786_s13 }
  0x1e   : > { %p789_p10 = pnand %p788_p9, %p787_p7 }
  0x1f   : > { %p794_p6 = por %p793_p2, %p792_p0 }
  0x20   : > { %p790_p11 = pneg %p789_p10 }
  0x22   : > { %p795_p5 = pnand %p794_p6, %p790_p11 }
  0x24   : > { %798 = shalt.err (!%p795_p5)
}
  0x25   : > { %699 = dma.hbm_to_vmem [thread:$0]  (!%p1007_p8), %s236_s30, 256, %s238_s8, %s225_s10  }
  0x26   : > { %246 = sbr.rel (%p962_p3) target bundleno = 638 (0x27e), region = 44  ;;  %s1024_s17 = sand.u32 (!%p962_p3), 1, %s876_s22  }
  0x27   : > { %s670_s7 = sshll.u32 (!%p962_p3), %s1024_s17, 4  ;;  %s249_s20 = scalar_lea.sflag (!%p962_p3), [#allocation3], %s1024_s17 }
  0x28   : > { %s252_s12 = scalar_lea.vmem (!%p962_p3), [#allocation2], %s670_s7 }
  0x2b   : > { %859 = dma.done.wait (%p989_p12), %s249_s20, 256  }
  0x2c   : > { %861 = vsyncadd (%p989_p12), %s249_s20, 4294967040 }
  0x2d   : > { %863 = dma.done.wait (%p44_p1), [#allocation6], 2304  }
  0x2e   : > { %865 = vsyncadd (%p44_p1), [#allocation6], 4294964992  ;;  %v1038_v0 = vld [vmem:[%s252_s12] sm:$0xff]  ;;  %s889_s29 = smov 113   ;;  %s890_s30 = smov 111   ;;  %v1046_v1 = vld [vmem:[%s252_s12 + $0x8] sm:$0xff]  ;;  %v294_v3 = vlaneseq }
  0x2f   : > { %351 = vrot.lane.b32.xlu1 %v1038_v0, %s889_s29  ;;  %375 = vrot.lane.b32.xlu0 %v1038_v0, %s890_s30  ;;  %s891_s8 = smov 112   ;;  %s892_s15 = smov 127   ;;  %v1079_v8 = vld [vmem:[#allocation5 + $0x80] sm:$0xff]  ;;  %v1081_v9 = vld [vmem:[#allocation5 + $0x88] sm:$0xff]  ;;  %v1083_v12 = vld [vmem:[#allocation5 + $0x70] sm:$0xff]  ;;  %vm408_vm3 = vcmask 1043456  }
  0x30   : > { %363 = vrot.lane.b32.xlu2 %v1038_v0, %s891_s8  ;;  %s893_s9 = smov 15   ;;  %s894_s10 = smov 1   ;;  %v1074_v6 = vand.u32 127, %v294_v3  ;;  %v1087_v14 = vld [vmem:[#allocation5 + $0x60] sm:$0xff]  ;;  %v1095_v18 = vld [vmem:[#allocation5 + $0x78] sm:$0xff]  ;;  %v1099_v20 = vld [vmem:[#allocation5 + $0x68] sm:$0xff] }
  0x31   : > { %s895_s13 = smov 17   ;;  %s896_s25 = smov 16   ;;  %v1112_v33 = vld [vmem:[#allocation5 + $0x50] sm:$0xff]  ;;  %v1114_v34 = vld [vmem:[#allocation5 + $0x58] sm:$0xff]  ;;  %v398_v41 = vld [vmem:[%s1290_s3] sm:$0xff]  ;;  %v897_v44 = vmov 0  }
  0x32   : > { %vm367_vm0 = vcmp.lt.s32.totalorder %v1074_v6, 112  ;;  %vm355_vm1 = vcmp.lt.s32.totalorder %v1074_v6, 113  ;;  %vm379_vm2 = vcmp.lt.s32.totalorder %v1074_v6, 111  ;;  %vm343_vm4 = vcmp.lt.s32.totalorder %v1074_v6, 127  ;;  %752 = vset.pattern.permute.xlu1 %v897_v44  ;;  %753 = vset.pattern.permute.xlu0 %v897_v44  ;;  %v1128_v48 = vld [vmem:[#allocation5 + $0x30] sm:$0xff]  ;;  %v1131_v49 = vld [vmem:[#allocation5 + $0x38] sm:$0xff] }
  0x33   : > { %vm331_vm5 = vcmp.lt.s32.totalorder %v1074_v6, 1  ;;  %vm319_vm6 = vcmp.lt.s32.totalorder %v1074_v6, 15  ;;  %v1133_v50 = vld [vmem:[#allocation5 + $0x20] sm:$0xff]  ;;  %v1135_v51 = vld [vmem:[#allocation5 + $0x28] sm:$0xff]  ;;  %vm296_vm7 = vcmp.lt.s32.totalorder %v1074_v6, 17  ;;  %vm307_vm8 = vcmp.lt.s32.totalorder %v1074_v6, 16 }
  0x34   : > { %vm404_vm9 = vcmask 588800  }
  0x37   : > { %353 = vrot.lane.b32.xlu1 %v1046_v1, %s889_s29  ;;  %377 = vrot.lane.b32.xlu0 %v1046_v1, %s890_s30 }
  0x38   : > { %365 = vrot.lane.b32.xlu2 %v1046_v1, %s891_s8 }
  0x3f   : > { %341 = vrot.lane.b32.xlu1 %v1046_v1, %s892_s15  ;;  %339 = vrot.lane.b32.xlu0 %v1038_v0, %s892_s15 }
  0x40   : > { %315 = vrot.lane.b32.xlu2 %v1038_v0, %s893_s9 }
  0x47   : > { %327 = vrot.lane.b32.xlu1 %v1038_v0, %s894_s10  ;;  %317 = vrot.lane.b32.xlu0 %v1046_v1, %s893_s9 }
  0x48   : > { %329 = vrot.lane.b32.xlu2 %v1046_v1, %s894_s10 }
  0x4f   : > { %292 = vrot.lane.b32.xlu1 %v1046_v1, %s895_s13  ;;  %290 = vrot.lane.b32.xlu0 %v1038_v0, %s895_s13 }
  0x50   : > { %303 = vrot.lane.b32.xlu2 %v1038_v0, %s896_s25 }
  0x57   : > { %305 = vrot.lane.b32.xlu0 %v1046_v1, %s896_s25  ;;  %401 = vperm.xlu1 %752, %v398_v41  }
  0x8a   : > { %v364_v2 = vpop.permute.xlu2 %363 }
  0x92   : > { %v366_v7 = vpop.permute.xlu2 %365 }
  0x93   : > { %v368_v13 = vsel %vm367_vm0, %v364_v2, %v366_v7  ;;  %v369_v19 = vsel %vm367_vm0, %v366_v7, %v364_v2  ;;  %v1153_v7 = vld [vmem:[#allocation5 + $0x8] sm:$0xff] }
  0x94   : > { %v373_v24 = vmul.f32 %v1083_v12, %v368_v13  ;;  %v374_v29 = vmul.f32 %v1095_v18, %v369_v19  ;;  %v1159_v13 = vld [vmem:[#allocation5 + $0x10] sm:$0xff] }
  0x9a   : > { %v316_v28 = vpop.permute.xlu2 %315 }
  0xa1   : > { %v352_v4 = vpop.permute.xlu1 %351  ;;  %v376_v5 = vpop.permute.xlu0 %375 }
  0xa2   : > { %v330_v47 = vpop.permute.xlu2 %329 }
  0xa9   : > { %v354_v10 = vpop.permute.xlu1 %353  ;;  %v378_v11 = vpop.permute.xlu0 %377 }
  0xaa   : > { %v356_v15 = vsel %vm355_vm1, %v352_v4, %v354_v10  ;;  %v380_v16 = vsel %vm379_vm2, %v376_v5, %v378_v11  ;;  %v381_v17 = vsel %vm379_vm2, %v378_v11, %v376_v5  ;;  %v357_v21 = vsel %vm355_vm1, %v354_v10, %v352_v4  ;;  %v1150_v4 = vld [vmem:[#allocation5] sm:$0xff]  ;;  %v304_v5 = vpop.permute.xlu2 %303 }
  0xab   : > { %v385_v22 = vmul.f32 %v1079_v8, %v380_v16  ;;  %v386_v23 = vmul.f32 %v1081_v9, %v381_v17  ;;  %v361_v25 = vmul.f32 %v1087_v14, %v356_v15  ;;  %v362_v30 = vmul.f32 %v1099_v20, %v357_v21  ;;  %v1161_v15 = vld [vmem:[#allocation5 + $0x18] sm:$0xff] }
  0xad   : > { %v395_v26 = vpack.c.bf16 %v385_v22, %v385_v22  ;;  %v396_v27 = vpack.c.bf16 %v386_v23, %v386_v23  ;;  %v393_v37 = vpack.c.bf16 %v373_v24, %v361_v25  ;;  %v394_v40 = vpack.c.bf16 %v374_v29, %v362_v30 }
  0xaf   : > { %v410_v31 = vsel %vm408_vm3, %v395_v26, 0  ;;  %v413_v32 = vsel %vm408_vm3, %v396_v27, 0  ;;  %v397_v27 = vld [vmem:[%s1289_s2] sm:$0xf] }
  0xb0   : > { %418 = vmatpush.bf16.msra.mxu0 %v410_v31  ;;  %431 = vmatpush.bf16.msra.mxu1 %v413_v32 }
  0xb1   : > { %v342_v35 = vpop.permute.xlu1 %341  ;;  %v340_v36 = vpop.permute.xlu0 %339 }
  0xb2   : > { %v344_v38 = vsel %vm343_vm4, %v340_v36, %v342_v35  ;;  %v345_v39 = vsel %vm343_vm4, %v342_v35, %v340_v36 }
  0xb3   : > { %v349_v42 = vmul.f32 %v1112_v33, %v344_v38  ;;  %v350_v43 = vmul.f32 %v1114_v34, %v345_v39 }
  0xb4   : > { %419 = vmatpush.bf16.msra.mxu0 %v393_v37  ;;  %432 = vmatpush.bf16.msra.mxu1 %v394_v40 }
  0xb5   : > { %v391_v45 = vpack.c.bf16 %v349_v42, %v1038_v0  ;;  %v392_v46 = vpack.c.bf16 %v350_v43, %v1046_v1 }
  0xb8   : > { %420 = vmatpush.bf16.msra.mxu0 %v391_v45  ;;  %433 = vmatpush.bf16.msra.mxu1 %v392_v46 }
  0xb9   : > { %v328_v52 = vpop.permute.xlu1 %327  ;;  %v318_v53 = vpop.permute.xlu0 %317 }
  0xba   : > { %v332_v54 = vsel %vm331_vm5, %v328_v52, %v330_v47  ;;  %v333_v55 = vsel %vm331_vm5, %v330_v47, %v328_v52  ;;  %v320_v56 = vsel %vm319_vm6, %v316_v28, %v318_v53  ;;  %v321_v57 = vsel %vm319_vm6, %v318_v53, %v316_v28 }
  0xbb   : > { %v337_v58 = vmul.f32 %v1128_v48, %v333_v55  ;;  %v338_v59 = vmul.f32 %v1131_v49, %v332_v54  ;;  %v325_v60 = vmul.f32 %v1133_v50, %v321_v57  ;;  %v326_v61 = vmul.f32 %v1135_v51, %v320_v56 }
  0xbd   : > { %v389_v62 = vpack.c.bf16 %v337_v58, %v325_v60  ;;  %v390_v63 = vpack.c.bf16 %v338_v59, %v326_v61  ;;  %v518_v60 = vld [vmem:[%s1292_s5] sm:$0xff] }
  0xbf   : > { %421 = vmatpush.bf16.msra.mxu0 %v389_v62  ;;  %434 = vmatpush.bf16.msra.mxu1 %v390_v63 }
  0xc1   : > { %v291_v2 = vpop.permute.xlu0 %290  ;;  %v293_v3 = vpop.permute.xlu1 %292 }
  0xc2   : > { %v297_v10 = vsel %vm296_vm7, %v291_v2, %v293_v3  ;;  %v298_v11 = vsel %vm296_vm7, %v293_v3, %v291_v2 }
  0xc3   : > { %v301_v21 = vmul.f32 %v1150_v4, %v298_v11  ;;  %v302_v22 = vmul.f32 %v1153_v7, %v297_v10 }
  0xc9   : > { %v306_v16 = vpop.permute.xlu0 %305  ;;  %v402_v28 = vpop.permute.xlu1 %401 }
  0xca   : > { %v308_v17 = vsel %vm307_vm8, %v304_v5, %v306_v16  ;;  %v309_v19 = vsel %vm307_vm8, %v306_v16, %v304_v5 }
  0xcb   : > { %v313_v23 = vmul.f32 %v1159_v13, %v309_v19  ;;  %v314_v24 = vmul.f32 %v1161_v15, %v308_v17 }
  0xcd   : > { %v387_v25 = vpack.c.bf16 %v313_v23, %v301_v21  ;;  %v388_v26 = vpack.c.bf16 %v314_v24, %v302_v22 }
  0xcf   : > { %422 = vmatpush.bf16.msra.mxu0 %v387_v25  ;;  %435 = vmatpush.bf16.msra.mxu1 %v388_v26 }
  0xd2   : > { %673 = vmatmul.msk.bf16.vlgmr.msra.gmra.mxu0 %vm404_vm9, %v397_v27  ;;  %674 = vmatmul.msk.bf16.vlgmr.msra.gmra.mxu1 %vm404_vm9, %v397_v27 }
 0x14f   : > { %v424_v29 = vpop.f32.mrf.mxu0  ;;  %v437_v30 = vpop.f32.mrf.mxu1 }
 0x150   : > { %v425_v31 = vadd.f32 %v424_v29, %v402_v28  ;;  %v438_v32 = vadd.f32 %v437_v30, %v402_v28 }
 0x152   : > { %v441_v35 = vmax.f32 %v425_v31, 0.0  ;;  %v442_v36 = vmax.f32 %v438_v32, 0.0 }
 0x154   : > { %483 = vrot.lane.b32.xlu1 %v441_v35, %s889_s29  ;;  %499 = vrot.lane.b32.xlu2 %v441_v35, %s890_s30 }
 0x155   : > { %501 = vrot.lane.b32.xlu0 %v442_v36, %s890_s30 }
 0x157   : > { %v426_v37 = vpop.f32.mrf.mxu0  ;;  %v439_v38 = vpop.f32.mrf.mxu1 }
 0x15c   : > { %493 = vrot.lane.b32.xlu1 %v442_v36, %s891_s8  ;;  %485 = vrot.lane.b32.xlu2 %v442_v36, %s889_s29  ;;  %s834_s29 = scalar_lea.hbm %s1293_s6, 32 }
 0x15d   : > { %491 = vrot.lane.b32.xlu0 %v441_v35, %s891_s8 }
 0x164   : > { %459 = vrot.lane.b32.xlu1 %v441_v35, %s893_s9  ;;  %475 = vrot.lane.b32.xlu2 %v441_v35, %s892_s15 }
 0x165   : > { %477 = vrot.lane.b32.xlu0 %v442_v36, %s892_s15  ;;  %s683_s15 = sshll.u32 %s957_s28, 4  ;;  %s566_s28 = scalar_lea.sflag [#allocation4], %s1024_s17 }
 0x16c   : > { %469 = vrot.lane.b32.xlu1 %v442_v36, %s894_s10  ;;  %461 = vrot.lane.b32.xlu2 %v442_v36, %s893_s9 }
 0x16d   : > { %467 = vrot.lane.b32.xlu0 %v441_v35, %s894_s10 }
 0x174   : > { %451 = vrot.lane.b32.xlu1 %v441_v35, %s896_s25  ;;  %443 = vrot.lane.b32.xlu2 %v441_v35, %s895_s13 }
 0x175   : > { %445 = vrot.lane.b32.xlu0 %v442_v36, %s895_s13  ;;  %s577_s13 = scalar_lea.hbm %s1293_s6, %s683_s15 }
 0x176   : > { %s581_s26 = sshll.u32 %s577_s13, 4  ;;  %s582_s26 = int_to_ptr.hbm [resolvable:$true] %s581_s26 }
 0x177   : > { %s828_s27 = sshra.s32 %s582_s26, 4  ;;  %s829_s27 = int_to_ptr.hbm [resolvable:$true] %s828_s27 }
 0x178   : > { %s830_s20 = scalar_lea.hbm %s829_s27, 16  ;;  %p835_p12 = scmp.lt.s32.totalorder %s829_s27, %s1293_s6 }
 0x179   : > { %p831_p1 = scmp.ne.s32.totalorder %s829_s27, %s830_s20  ;;  %p836_p8 = scmp.lt.s32.totalorder %s834_s29, %s830_s20 }
 0x17b   : > { %p832_p3 = pnand %p831_p1, %p993_p13  ;;  %p837_p7 = por %p836_p8, %p835_p12 }
 0x17c   : > { %453 = vrot.lane.b32.xlu2 %v442_v36, %s896_s25  ;;  %s286_s25 = scalar_lea.vmem [#allocation7], %s670_s7 }
 0x17d   : > { %521 = vperm.xlu0 %753, %v518_v60   ;;  %s579_s19 = sshll.u32 %s286_s25, 4  ;;  %p833_p5 = pneg %p832_p3  ;;  %s580_s19 = int_to_ptr.vmem [resolvable:$true] %s579_s19 }
 0x17f   : > { %p838_p9 = pnand %p837_p7, %p833_p5 }
 0x1ae   : > { %v500_v39 = vpop.permute.xlu2 %499 }
 0x1b6   : > { %v486_v40 = vpop.permute.xlu2 %485 }
 0x1be   : > { %v476_v43 = vpop.permute.xlu2 %475 }
 0x1c6   : > { %v484_v41 = vpop.permute.xlu1 %483  ;;  %v462_v3 = vpop.permute.xlu2 %461 }
 0x1c7   : > { %v502_v42 = vpop.permute.xlu0 %501  ;;  %v487_v56 = vsel %vm355_vm1, %v484_v41, %v486_v40  ;;  %v488_v57 = vsel %vm355_vm1, %v486_v40, %v484_v41 }
 0x1c8   : > { %v503_v44 = vsel %vm379_vm2, %v500_v39, %v502_v42  ;;  %v504_v45 = vsel %vm379_vm2, %v502_v42, %v500_v39  ;;  %v489_v61 = vmul.f32 %v487_v56, %v1087_v14  ;;  %v490_v62 = vmul.f32 %v488_v57, %v1099_v20 }
 0x1c9   : > { %v505_v46 = vmul.f32 %v503_v44, %v1079_v8  ;;  %v506_v47 = vmul.f32 %v504_v45, %v1081_v9 }
 0x1cb   : > { %v515_v52 = vpack.c.bf16 %v505_v46, %v505_v46  ;;  %v516_v53 = vpack.c.bf16 %v506_v47, %v506_v47 }
 0x1cd   : > { %v528_v54 = vsel %vm408_vm3, %v515_v52, 0  ;;  %v531_v55 = vsel %vm408_vm3, %v516_v53, 0 }
 0x1ce   : > { %536 = vmatpush.bf16.msra.mxu2 %v528_v54  ;;  %549 = vmatpush.bf16.msra.mxu3 %v531_v55  ;;  %v494_v58 = vpop.permute.xlu1 %493  ;;  %v444_v21 = vpop.permute.xlu2 %443 }
 0x1cf   : > { %v492_v59 = vpop.permute.xlu0 %491 }
 0x1d0   : > { %v495_v8 = vsel %vm367_vm0, %v492_v59, %v494_v58  ;;  %v496_v9 = vsel %vm367_vm0, %v494_v58, %v492_v59 }
 0x1d1   : > { %v497_v63 = vmul.f32 %v495_v8, %v1083_v12  ;;  %v498_v2 = vmul.f32 %v496_v9, %v1095_v18 }
 0x1d3   : > { %v513_v5 = vpack.c.bf16 %v497_v63, %v489_v61  ;;  %v514_v10 = vpack.c.bf16 %v498_v2, %v490_v62 }
 0x1d5   : > { %537 = vmatpush.bf16.msra.mxu2 %v513_v5  ;;  %550 = vmatpush.bf16.msra.mxu3 %v514_v10 }
 0x1d6   : > { %v460_v11 = vpop.permute.xlu1 %459  ;;  %v454_v32 = vpop.permute.xlu2 %453 }
 0x1d7   : > { %v478_v16 = vpop.permute.xlu0 %477  ;;  %v463_v22 = vsel %vm319_vm6, %v460_v11, %v462_v3  ;;  %v464_v23 = vsel %vm319_vm6, %v462_v3, %v460_v11 }
 0x1d8   : > { %v479_v17 = vsel %vm343_vm4, %v476_v43, %v478_v16  ;;  %v480_v14 = vsel %vm343_vm4, %v478_v16, %v476_v43  ;;  %v466_v27 = vmul.f32 %v463_v22, %v1135_v51 }
 0x1d9   : > { %v481_v20 = vmul.f32 %v479_v17, %v1112_v33  ;;  %v482_v12 = vmul.f32 %v480_v14, %v1114_v34  ;;  %v465_v34 = vmul.f32 %v464_v23, %v1133_v50 }
 0x1db   : > { %v511_v19 = vpack.c.bf16 %v481_v20, %v441_v35  ;;  %v512_v18 = vpack.c.bf16 %v482_v12, %v442_v36 }
 0x1dd   : > { %538 = vmatpush.bf16.msra.mxu2 %v511_v19  ;;  %551 = vmatpush.bf16.msra.mxu3 %v512_v18 }
 0x1de   : > { %v470_v24 = vpop.permute.xlu1 %469 }
 0x1df   : > { %v468_v25 = vpop.permute.xlu0 %467 }
 0x1e0   : > { %v471_v26 = vsel %vm331_vm5, %v468_v25, %v470_v24  ;;  %v472_v33 = vsel %vm331_vm5, %v470_v24, %v468_v25 }
 0x1e1   : > { %v473_v28 = vmul.f32 %v472_v33, %v1128_v48  ;;  %v474_v29 = vmul.f32 %v471_v26, %v1131_v49 }
 0x1e3   : > { %v509_v30 = vpack.c.bf16 %v473_v28, %v465_v34  ;;  %v510_v31 = vpack.c.bf16 %v474_v29, %v466_v27 }
 0x1e5   : > { %539 = vmatpush.bf16.msra.mxu2 %v509_v30  ;;  %552 = vmatpush.bf16.msra.mxu3 %v510_v31 }
 0x1e6   : > { %v452_v35 = vpop.permute.xlu1 %451 }
 0x1e7   : > { %v455_v36 = vsel %vm307_vm8, %v452_v35, %v454_v32  ;;  %v456_v37 = vsel %vm307_vm8, %v454_v32, %v452_v35  ;;  %v446_v50 = vpop.permute.xlu0 %445 }
 0x1e8   : > { %v457_v51 = vmul.f32 %v456_v37, %v1159_v13  ;;  %v458_v48 = vmul.f32 %v455_v36, %v1161_v15  ;;  %v447_v49 = vsel %vm296_vm7, %v444_v21, %v446_v50  ;;  %v448_v38 = vsel %vm296_vm7, %v446_v50, %v444_v21  ;;  %v517_v13 = vld [vmem:[%s1291_s4] sm:$0xf] }
 0x1e9   : > { %v449_v39 = vmul.f32 %v448_v38, %v1150_v4  ;;  %v450_v40 = vmul.f32 %v447_v49, %v1153_v7 }
 0x1eb   : > { %v507_v41 = vpack.c.bf16 %v457_v51, %v449_v39  ;;  %v508_v42 = vpack.c.bf16 %v458_v48, %v450_v40 }
 0x1ed   : > { %540 = vmatpush.bf16.msra.mxu2 %v507_v41  ;;  %553 = vmatpush.bf16.msra.mxu3 %v508_v42 }
 0x1ef   : > { %v522_v6 = vpop.permute.xlu0 %521 }
 0x1f0   : > { %675 = vmatmul.msk.bf16.vlgmr.msra.gmra.mxu2 %vm404_vm9, %v517_v13  ;;  %676 = vmatmul.msk.bf16.vlgmr.msra.gmra.mxu3 %vm404_vm9, %v517_v13 }
 0x273   : > { %v542_v15 = vpop.f32.mrf.mxu2  ;;  %v555_v43 = vpop.f32.mrf.mxu3 }
 0x274   : > { %v543_v4 = vadd.f32 %v542_v15, %v522_v6  ;;  %v556_v7 = vadd.f32 %v555_v43, %v522_v6 }
 0x276   : > { %v559_v44 = vadd.f32 %v543_v4, %v1038_v0  ;;  %v560_v45 = vadd.f32 %v556_v7, %v1046_v1 }
 0x278   : > { %v561_v46 = vmax.f32 %v559_v44, 0.0  ;;  %v562_v47 = vmax.f32 %v560_v45, 0.0 }
 0x27a   : > { %563 = vst [vmem:[%s286_s25] sm:$0xff] %v561_v46 }
 0x27b   : > { %564 = vst [vmem:[%s286_s25 + $0x8] sm:$0xff] %v562_v47  ;;  %v544_v52 = vpop.f32.mrf.mxu2  ;;  %v557_v53 = vpop.f32.mrf.mxu3 }
 0x27c   : > { %841 = shalt.err (!%p838_p9)
}
 0x27d   : > { %690 = dma.vmem_to_hbm [thread:$0]  (%p993_p13), %s580_s19, 256, %s582_s26, %s566_s28  }
 0x27e PF: > { %s593_s17 = sand.u32 1, %s872_s21   ;;  %p1299_p10 = scmp.ge.s32.totalorder %s884_s24, 2 }
 0x27f   : > { %s594_s15 = scalar_lea.sflag [#allocation4], %s593_s17 }
 0x280   : > { %p701_p11 = pnand %p1299_p10, %p998_p4 }
 0x282   : > { %p702_p0 = pneg %p701_p11 }
 0x284   : > { %867 = dma.done.wait (%p702_p0), %s594_s15, 256  }
 0x285   : > { %869 = vsyncadd (%p702_p0), %s594_s15, 4294967040  ;;  %p20_p2 = scmp.ge.s32.totalorder %s973_s11, 4   ;;  %s1300_s21 = smov %s876_s22 }
 0x286   : > { %s1301_s22 = smov %s880_s23  ;;  %s1302_s23 = smov %s985_s14 }
 0x287   : > { %s1303_s24 = smov %s973_s11  ;;  %22 = sbr.rel (!%p20_p2) target bundleno = 6 (0x6), region = 100 }
 0x28c   :  { %600 = vsyncpa [#allocation3], 1 }
 0x28d   :  { %602 = vsyncpa [#allocation3 + $0x1], 1 }
 0x28e   :  { %603 = vsyncpa [#allocation6], 1 }
 0x28f   :  { %604 = vsyncpa [#allocation4], 1 }
 0x290   :  { %606 = vsyncpa [#allocation4 + $0x1], 1 }

</bundles_post_ra>
